<compile_context>
chip_gen: v6e
topology: v6e:2x2x1
jax: 0.10.0
libtpu: 0.0.40
codegen_flags: <defaults>
</compile_context>

<pallas_src>
import functools
import math

import jax
import jax.numpy as jnp
import numpy as np
from jax import lax
from jax.experimental import pallas as pl
from jax.experimental.pallas import tpu as pltpu


def _pick_tile(dim, pref):
    """Largest power-of-two-ish tile <= pref dividing dim, else the full dim."""
    t = pref
    while t > 8:
        if dim % t == 0:
            return t
        t //= 2
    return dim


# ---------------------------------------------------------------------------
# Fused QKV projection GEMM with RoPE applied in the epilogue
# ---------------------------------------------------------------------------

def _qkv_rope_kernel(x_ref, w_ref, rope_ref, oq_ref, ok_ref, ov_ref, acc_ref, *,
                     n_heads, n_kv_heads, head_dim, nq, nkv):
    @pl.when(pl.program_id(1) == 0)
    def _init():
        acc_ref[...] = jnp.zeros_like(acc_ref)

    acc_ref[...] += jnp.dot(x_ref[...], w_ref[...],
                            preferred_element_type=jnp.float32)

    @pl.when(pl.program_id(1) == pl.num_programs(1) - 1)
    def _flush():
        h2 = head_dim // 2
        c = rope_ref[:, :h2]          # (tm, h2) f32
        s = rope_ref[:, h2:]          # (tm, h2) f32
        acc = acc_ref[...]            # (tm, nq + 2*nkv) f32

        def rotate(base, nh):
            # Weight columns are permuted per head to [even dims | odd dims],
            # so the interleaved-complex rotation is two half-width multiplies.
            cols = []
            for h in range(nh):
                lo = base + h * head_dim
                e = acc[:, lo:lo + h2]
                o = acc[:, lo + h2:lo + head_dim]
                cols.append(e * c - o * s)
                cols.append(e * s + o * c)
            return jnp.concatenate(cols, axis=-1)

        # One dense store per output slab.
        oq_ref[...] = rotate(0, n_heads).astype(oq_ref.dtype)
        ok_ref[...] = rotate(nq, n_kv_heads).astype(ok_ref.dtype)
        ov_ref[...] = acc[:, nq + nkv:].astype(ov_ref.dtype)


def qkv_rope_proj(x2d, w_qkv, rope, *, n_heads, n_kv_heads, head_dim,
                  tm=256, tk=512):
    """x2d @ [Wq|Wk|Wv] with RoPE fused into the K-flush epilogue.

    Returns (q, k, v) bf16 2D arrays (q/k already rotated, scale folded into Wq).
    N is kept as a single full-width block so the rotation sees whole heads.
    """
    M, K = x2d.shape
    ntot = w_qkv.shape[1]
    nq = n_heads * head_dim
    nkv = n_kv_heads * head_dim
    tm = _pick_tile(M, tm)
    tk = _pick_tile(K, tk)
    grid = (M // tm, K // tk)
    kernel = functools.partial(
        _qkv_rope_kernel, n_heads=n_heads, n_kv_heads=n_kv_heads,
        head_dim=head_dim, nq=nq, nkv=nkv)
    return pl.pallas_call(
        kernel,
        out_shape=(
            jax.ShapeDtypeStruct((M, nq), jnp.bfloat16),
            jax.ShapeDtypeStruct((M, nkv), jnp.bfloat16),
            jax.ShapeDtypeStruct((M, nkv), jnp.bfloat16),
        ),
        grid=grid,
        in_specs=[
            pl.BlockSpec((tm, tk), lambda i, k: (i, k)),
            pl.BlockSpec((tk, ntot), lambda i, k: (k, 0)),
            # rope block index does not depend on k -> DMA'd once per M tile.
            pl.BlockSpec((tm, head_dim), lambda i, k: (i, 0)),
        ],
        out_specs=(
            pl.BlockSpec((tm, nq), lambda i, k: (i, 0)),
            pl.BlockSpec((tm, nkv), lambda i, k: (i, 0)),
            pl.BlockSpec((tm, nkv), lambda i, k: (i, 0)),
        ),
        scratch_shapes=[pltpu.VMEM((tm, ntot), jnp.float32)],
        compiler_params=pltpu.CompilerParams(
            dimension_semantics=("parallel", "arbitrary")),
    )(x2d, w_qkv, rope)


# ---------------------------------------------------------------------------
# Generic tiled matmul (output projection)
# ---------------------------------------------------------------------------

def _matmul_kernel(x_ref, w_ref, o_ref, acc_ref):
    @pl.when(pl.program_id(2) == 0)
    def _():
        acc_ref[...] = jnp.zeros_like(acc_ref)

    acc_ref[...] += jnp.dot(x_ref[...], w_ref[...],
                            preferred_element_type=jnp.float32)

    @pl.when(pl.program_id(2) == pl.num_programs(2) - 1)
    def _():
        o_ref[...] = acc_ref[...].astype(o_ref.dtype)


def linear(x2d, w, out_dtype, *, tm=512, tn=256, tk=512):
    """y = x2d @ w, tiled over (M, N, K) with an f32 VMEM accumulator."""
    M, K = x2d.shape
    K2, N = w.shape
    assert K == K2
    tm = _pick_tile(M, tm)
    tn = _pick_tile(N, tn)
    tk = _pick_tile(K, tk)
    grid = (M // tm, N // tn, K // tk)
    return pl.pallas_call(
        _matmul_kernel,
        out_shape=jax.ShapeDtypeStruct((M, N), out_dtype),
        grid=grid,
        in_specs=[
            pl.BlockSpec((tm, tk), lambda i, j, k: (i, k)),
            pl.BlockSpec((tk, tn), lambda i, j, k: (k, j)),
        ],
        out_specs=pl.BlockSpec((tm, tn), lambda i, j, k: (i, j)),
        scratch_shapes=[pltpu.VMEM((tm, tn), jnp.float32)],
        compiler_params=pltpu.CompilerParams(
            dimension_semantics=("parallel", "parallel", "arbitrary")),
    )(x2d, w)


# ---------------------------------------------------------------------------
# Flash-attention core (causal softmax + weighted values, GQA)
# q/k arrive pre-rotated and pre-scaled from the projection GEMM.
# ---------------------------------------------------------------------------

def _flash_attn_kernel(q_ref, k_ref, v_ref, o_ref, m_ref, l_ref, acc_ref, *,
                       n_q_heads, n_kv_heads, head_dim, tq, tkv):
    qi = pl.program_id(1)
    kj = pl.program_id(2)
    n_rep = n_q_heads // n_kv_heads

    @pl.when(kj == 0)
    def _init():
        m_ref[...] = jnp.full_like(m_ref, -1e30)
        l_ref[...] = jnp.zeros_like(l_ref)
        acc_ref[...] = jnp.zeros_like(acc_ref)

    q_start = qi * tq
    k_start = kj * tkv

    # Causal prefill: kv tiles strictly above the diagonal contribute nothing.
    @pl.when(k_start <= q_start + tq - 1)
    def _compute():
        # Additive causal mask built in-register from iota (no HBM mask).
        q_pos = q_start + lax.broadcasted_iota(jnp.int32, (tq, tkv), 0)
        k_pos = k_start + lax.broadcasted_iota(jnp.int32, (tq, tkv), 1)
        mask_add = jnp.where(k_pos > q_pos, jnp.float32(-1e30), jnp.float32(0.0))

        q_all = q_ref[0]                       # (tq, Hq*hd) bf16, rotated+scaled
        k_all = k_ref[0]                       # (tkv, Hkv*hd) bf16, rotated
        v_all = v_ref[0]                       # (tkv, Hkv*hd) bf16

        # Slice each KV head once; reused by its n_rep query heads (GQA).
        k_heads = [k_all[:, hk * head_dim:(hk + 1) * head_dim]
                   for hk in range(n_kv_heads)]
        v_heads = [v_all[:, hk * head_dim:(hk + 1) * head_dim]
                   for hk in range(n_kv_heads)]

        m_prev = m_ref[...]                    # (tq, Hq)
        l_prev = l_ref[...]
        acc_prev = acc_ref[...]                # (tq, Hq*hd)

        m_cols, l_cols, acc_cols = [], [], []
        for h in range(n_q_heads):
            hk = h // n_rep
            lo = h * head_dim
            # scores = q_h @ k_h^T, contracted over head_dim (no transpose mat.)
            s = lax.dot_general(q_all[:, lo:lo + head_dim], k_heads[hk],
                                (((1,), (1,)), ((), ())),
                                preferred_element_type=jnp.float32)
            s = s + mask_add

            m_p = m_prev[:, h:h + 1]
            m_new = jnp.maximum(m_p, jnp.max(s, axis=-1, keepdims=True))
            alpha = jnp.exp(m_p - m_new)
            p = jnp.exp(s - m_new)
            l_cols.append(alpha * l_prev[:, h:h + 1]
                          + jnp.sum(p, axis=-1, keepdims=True))
            m_cols.append(m_new)

            pv = jnp.dot(p.astype(jnp.bfloat16), v_heads[hk],
                         preferred_element_type=jnp.float32)
            acc_cols.append(alpha * acc_prev[:, lo:lo + head_dim] + pv)

        # Single lane-dense store per statistic / accumulator per kv step.
        m_ref[...] = jnp.concatenate(m_cols, axis=-1)
        l_ref[...] = jnp.concatenate(l_cols, axis=-1)
        acc_ref[...] = jnp.concatenate(acc_cols, axis=-1)

    @pl.when(kj == pl.num_programs(2) - 1)
    def _finalize():
        inv_l = pl.reciprocal(l_ref[...], approx=True)   # (tq, Hq)
        acc = acc_ref[...]
        out_cols = [acc[:, h * head_dim:(h + 1) * head_dim] * inv_l[:, h:h + 1]
                    for h in range(n_q_heads)]
        o_ref[0] = jnp.concatenate(out_cols, axis=-1).astype(o_ref.dtype)


def flash_attention(q, k, v, *, n_heads, n_kv_heads, head_dim, tq=256, tkv=256):
    """q: (B, S, Hq*hd) bf16; k/v: (B, S, Hkv*hd) bf16 -> (B, S, Hq*hd) bf16.

    Defaults target v6e (128 MiB VMEM); for v7x (64 MiB) or very wide models
    drop tq to 128 and set vmem_limit_bytes explicitly.
    """
    B, S, NQ = q.shape
    NKV = k.shape[-1]
    tq = _pick_tile(S, tq)
    tkv = _pick_tile(S, tkv)
    grid = (B, S // tq, S // tkv)

    def kv_index_map(b, qi, kj):
        # Clamp so fully-masked (above-diagonal) kv tiles are never re-DMA'd:
        # Pallas skips the copy when the block index repeats.
        max_kj = (qi * tq + tq - 1) // tkv
        return (b, jnp.minimum(kj, max_kj), 0)

    kernel = functools.partial(
        _flash_attn_kernel, n_q_heads=n_heads, n_kv_heads=n_kv_heads,
        head_dim=head_dim, tq=tq, tkv=tkv)
    return pl.pallas_call(
        kernel,
        out_shape=jax.ShapeDtypeStruct((B, S, NQ), jnp.bfloat16),
        grid=grid,
        in_specs=[
            pl.BlockSpec((1, tq, NQ), lambda b, qi, kj: (b, qi, 0)),
            pl.BlockSpec((1, tkv, NKV), kv_index_map),
            pl.BlockSpec((1, tkv, NKV), kv_index_map),
        ],
        out_specs=pl.BlockSpec((1, tq, NQ), lambda b, qi, kj: (b, qi, 0)),
        scratch_shapes=[
            pltpu.VMEM((tq, n_heads), jnp.float32),   # running max m (per head)
            pltpu.VMEM((tq, n_heads), jnp.float32),   # running sum l (per head)
            pltpu.VMEM((tq, NQ), jnp.float32),        # output accumulator
        ],
        compiler_params=pltpu.CompilerParams(
            dimension_semantics=("parallel", "parallel", "arbitrary")),
    )(q, k, v)


# ---------------------------------------------------------------------------
# Module wrapper
# ---------------------------------------------------------------------------

def _deinterleave_perm(n_heads, head_dim):
    idx = []
    for h in range(n_heads):
        idx += [h * head_dim + j for j in range(0, head_dim, 2)]
        idx += [h * head_dim + j for j in range(1, head_dim, 2)]
    return np.array(idx, dtype=np.int32)


def attention_forward(x, params, rope, *, n_heads, n_kv_heads):
    """Equivalent of Attention.forward(x, start_pos=0, freqs_cis, causal mask)."""
    B, S, D = x.shape
    hd = D // n_heads
    nq = n_heads * hd

    x2d = x.reshape(B * S, D).astype(jnp.bfloat16)
    # rope rows follow the flattened (b, s) layout of x2d (tiny array).
    rope_bs = jnp.broadcast_to(rope[None], (B, S, hd)).reshape(B * S, hd)

    # Fused QKV projection + RoPE; q/k/v emitted directly (no wrapper slices).
    q2d, k2d, v2d = qkv_rope_proj(
        x2d, params["w_qkv"], rope_bs,
        n_heads=n_heads, n_kv_heads=n_kv_heads, head_dim=hd)

    q = q2d.reshape(B, S, nq)
    k = k2d.reshape(B, S, n_kv_heads * hd)
    v = v2d.reshape(B, S, n_kv_heads * hd)
    # start_pos == 0: keys/values read back from the zero-init cache equal xk/xv.

    o = flash_attention(q, k, v, n_heads=n_heads, n_kv_heads=n_kv_heads,
                        head_dim=hd)

    out = linear(o.reshape(B * S, nq), params["wo"], jnp.float32)
    return out.reshape(B, S, D)


# ---------------------------------------------------------------------------
# Pure-JAX reference (mirrors the PyTorch code path) for a sanity check
# ---------------------------------------------------------------------------

def reference_attention(x, wq, wk, wv, wo, cos, sin, mask, *, n_heads, n_kv_heads):
    B, S, D = x.shape
    hd = D // n_heads
    n_rep = n_heads // n_kv_heads

    xq = (x.reshape(B * S, D) @ wq).reshape(B, S, n_heads, hd)
    xk = (x.reshape(B * S, D) @ wk).reshape(B, S, n_kv_heads, hd)
    xv = (x.reshape(B * S, D) @ wv).reshape(B, S, n_kv_heads, hd)

    def rope(t):
        tr = t.reshape(*t.shape[:-1], hd // 2, 2)
        te, to = tr[..., 0], tr[..., 1]
        c = cos[None, :, None, :]
        s = sin[None, :, None, :]
        re = te * c - to * s
        im = te * s + to * c
        return jnp.stack([re, im], axis=-1).reshape(t.shape)

    xq, xk = rope(xq), rope(xk)
    keys = jnp.repeat(xk, n_rep, axis=2)
    vals = jnp.repeat(xv, n_rep, axis=2)

    q = jnp.transpose(xq, (0, 2, 1, 3))
    k = jnp.transpose(keys, (0, 2, 1, 3))
    v = jnp.transpose(vals, (0, 2, 1, 3))

    scores = jnp.einsum("bhqd,bhkd->bhqk", q, k) / math.sqrt(hd) + mask
    p = jax.nn.softmax(scores.astype(jnp.float32), axis=-1)
    out = jnp.einsum("bhqk,bhkd->bhqd", p, v)
    out = jnp.transpose(out, (0, 2, 1, 3)).reshape(B, S, n_heads * hd)
    return out @ wo


# ---------------------------------------------------------------------------
# Main
# ---------------------------------------------------------------------------

if __name__ == "__main__":
    # Small ModelArgs-like configuration.
    B, S = 2, 8
    dim = 32
    n_heads = 4
    n_kv_heads = 2
    head_dim = dim // n_heads        # 8

    key = jax.random.PRNGKey(0)
    kx, kq, kk, kv, ko = jax.random.split(key, 5)

    x = jax.random.normal(kx, (B, S, dim), dtype=jnp.float32)

    # Deterministic parameter init (stored as (in, out) for y = x @ W).
    wq = 0.02 * jax.random.normal(kq, (dim, n_heads * head_dim), dtype=jnp.float32)
    wk = 0.02 * jax.random.normal(kk, (dim, n_kv_heads * head_dim), dtype=jnp.float32)
    wv = 0.02 * jax.random.normal(kv, (dim, n_kv_heads * head_dim), dtype=jnp.float32)
    wo = 0.02 * jax.random.normal(ko, (n_heads * head_dim, dim), dtype=jnp.float32)

    # freqs_cis (cos/sin of precomputed rotary frequencies), shape (S, head_dim//2).
    theta = 10000.0
    freqs = 1.0 / (theta ** (np.arange(0, head_dim, 2, dtype=np.float32) / head_dim))
    t = np.arange(S, dtype=np.float32)
    angles = np.outer(t, freqs)                     # (S, head_dim//2)
    cos = jnp.asarray(np.cos(angles), dtype=jnp.float32)
    sin = jnp.asarray(np.sin(angles), dtype=jnp.float32)
    rope = jnp.concatenate([cos, sin], axis=-1)     # (S, head_dim) lane-dense [cos|sin]

    # Causal mask (reference only; the kernel builds it in-register via iota).
    mask = jnp.triu(jnp.full((S, S), float("-inf"), dtype=jnp.float32), k=1)

    # Fused + column-permuted QKV weight ([even dims | odd dims] per q/k head),
    # with 1/sqrt(head_dim) folded into the q columns; bf16.
    perm_q = _deinterleave_perm(n_heads, head_dim)
    perm_k = _deinterleave_perm(n_kv_heads, head_dim)
    inv_scale = 1.0 / math.sqrt(head_dim)
    w_qkv = jnp.concatenate([wq[:, perm_q] * inv_scale, wk[:, perm_k], wv], axis=1)
    params = {
        "w_qkv": w_qkv.astype(jnp.bfloat16),
        "wo": wo.astype(jnp.bfloat16),
    }

    out = attention_forward(x, params, rope,
                            n_heads=n_heads, n_kv_heads=n_kv_heads)
    out = jax.block_until_ready(out)

    ref = reference_attention(x, wq, wk, wv, wo, cos, sin, mask,
                              n_heads=n_heads, n_kv_heads=n_kv_heads)
    ref = jax.block_until_ready(ref)

    assert out.shape == (B, S, dim)
    # bf16 MXU inputs (f32 accumulation) vs an all-f32 reference.
    np.testing.assert_allclose(np.asarray(out), np.asarray(ref), rtol=2e-2, atol=2e-3)

    print("KERNEL_OK")
</pallas_src>

<mosaic_0001>
module attributes {stable_mosaic.version = 11 : i64} {
  func.func @_qkv_rope_kernel(%arg0: i32, %arg1: i32, %arg2: memref<16x32xbf16, #tpu.memory_space<vmem>>, %arg3: memref<32x64xbf16, #tpu.memory_space<vmem>>, %arg4: memref<16x8xf32, #tpu.memory_space<vmem>>, %arg5: memref<16x32xbf16, #tpu.memory_space<vmem>>, %arg6: memref<16x16xbf16, #tpu.memory_space<vmem>>, %arg7: memref<16x16xbf16, #tpu.memory_space<vmem>>, %arg8: memref<16x64xf32, #tpu.memory_space<vmem>>) attributes {dimension_semantics = [#tpu.dimension_semantics<parallel>, #tpu.dimension_semantics<arbitrary>], iteration_bounds = array<i64: 1, 1>, scalar_prefetch = 0 : i64, scratch_operands = 1 : i64, tpu.core_type = #tpu.core_type<tc>, window_params = [{transform_indices = @transform_0, window_bounds = array<i64: 16, 32>}, {transform_indices = @transform_1, window_bounds = array<i64: 32, 64>}, {transform_indices = @transform_2, window_bounds = array<i64: 16, 8>}, {transform_indices = @transform_3, window_bounds = array<i64: 16, 32>}, {transform_indices = @transform_4, window_bounds = array<i64: 16, 16>}, {transform_indices = @transform_5, window_bounds = array<i64: 16, 16>}]} {
    %c0_i32 = arith.constant 0 : i32
    %0 = arith.cmpi eq, %arg1, %c0_i32 : i32
    %1 = arith.extui %0 : i1 to i32
    %c0_i32_0 = arith.constant 0 : i32
    %2 = arith.cmpi ne, %1, %c0_i32_0 : i32
    scf.if %2 {
      %cst_10 = arith.constant 0.000000e+00 : f32
      %12 = vector.broadcast %cst_10 : f32 to vector<16x64xf32>
      %c0_11 = arith.constant 0 : index
      %c0_12 = arith.constant 0 : index
      %13 = vector.load %arg8[%c0_11, %c0_12] : memref<16x64xf32, #tpu.memory_space<vmem>>, vector<16x64xf32>
      tpu.vector_store %arg8[%c0_11, %c0_12], %12 {strides = array<i32>} : memref<16x64xf32, #tpu.memory_space<vmem>>, vector<16x64xf32>,
    } else {
    }
    %c0 = arith.constant 0 : index
    %c0_1 = arith.constant 0 : index
    %3 = vector.load %arg8[%c0, %c0_1] : memref<16x64xf32, #tpu.memory_space<vmem>>, vector<16x64xf32>
    %c0_2 = arith.constant 0 : index
    %c0_3 = arith.constant 0 : index
    %4 = vector.load %arg2[%c0_2, %c0_3] : memref<16x32xbf16, #tpu.memory_space<vmem>>, vector<16x32xbf16>
    %c0_4 = arith.constant 0 : index
    %c0_5 = arith.constant 0 : index
    %5 = vector.load %arg3[%c0_4, %c0_5] : memref<32x64xbf16, #tpu.memory_space<vmem>>, vector<32x64xbf16>
    %cst = arith.constant dense<0.000000e+00> : vector<16x64xf32>
    %6 = tpu.matmul %4, %5, %cst {dimension_numbers = #tpu.dot_dimension_numbers<[1], [0], [0], [1], [0, 0, 1, 1], [], []>} : vector<16x32xbf16>, vector<32x64xbf16>, vector<16x64xf32> -> vector<16x64xf32>
    %7 = arith.addf %3, %6 : vector<16x64xf32>
    %c0_6 = arith.constant 0 : index
    %c0_7 = arith.constant 0 : index
    %8 = vector.load %arg8[%c0_6, %c0_7] : memref<16x64xf32, #tpu.memory_space<vmem>>, vector<16x64xf32>
    tpu.vector_store %arg8[%c0_6, %c0_7], %7 {strides = array<i32>} : memref<16x64xf32, #tpu.memory_space<vmem>>, vector<16x64xf32>,
    %c0_i32_8 = arith.constant 0 : i32
    %9 = arith.cmpi eq, %arg1, %c0_i32_8 : i32
    %10 = arith.extui %9 : i1 to i32
    %c0_i32_9 = arith.constant 0 : i32
    %11 = arith.cmpi ne, %10, %c0_i32_9 : i32
    scf.if %11 {
      %c0_10 = arith.constant 0 : index
      %c0_11 = arith.constant 0 : index
      %12 = vector.load %arg4[%c0_10, %c0_11] : memref<16x8xf32, #tpu.memory_space<vmem>>, vector<16x4xf32>
      %c0_12 = arith.constant 0 : index
      %c4 = arith.constant 4 : index
      %13 = vector.load %arg4[%c0_12, %c4] : memref<16x8xf32, #tpu.memory_space<vmem>>, vector<16x4xf32>
      %c0_13 = arith.constant 0 : index
      %c0_14 = arith.constant 0 : index
      %14 = vector.load %arg8[%c0_13, %c0_14] : memref<16x64xf32, #tpu.memory_space<vmem>>, vector<16x64xf32>
      %15 = vector.extract_strided_slice %14 {offsets = [0, 0], sizes = [16, 4], strides = [1, 1]} : vector<16x64xf32> to vector<16x4xf32>
      %16 = vector.extract_strided_slice %14 {offsets = [0, 4], sizes = [16, 4], strides = [1, 1]} : vector<16x64xf32> to vector<16x4xf32>
      %17 = arith.mulf %15, %12 : vector<16x4xf32>
      %18 = arith.mulf %16, %13 : vector<16x4xf32>
      %19 = arith.subf %17, %18 : vector<16x4xf32>
      %20 = arith.mulf %15, %13 : vector<16x4xf32>
      %21 = arith.mulf %16, %12 : vector<16x4xf32>
      %22 = arith.addf %20, %21 : vector<16x4xf32>
      %23 = vector.extract_strided_slice %14 {offsets = [0, 8], sizes = [16, 4], strides = [1, 1]} : vector<16x64xf32> to vector<16x4xf32>
      %24 = vector.extract_strided_slice %14 {offsets = [0, 12], sizes = [16, 4], strides = [1, 1]} : vector<16x64xf32> to vector<16x4xf32>
      %25 = arith.mulf %23, %12 : vector<16x4xf32>
      %26 = arith.mulf %24, %13 : vector<16x4xf32>
      %27 = arith.subf %25, %26 : vector<16x4xf32>
      %28 = arith.mulf %23, %13 : vector<16x4xf32>
      %29 = arith.mulf %24, %12 : vector<16x4xf32>
      %30 = arith.addf %28, %29 : vector<16x4xf32>
      %31 = vector.extract_strided_slice %14 {offsets = [0, 16], sizes = [16, 4], strides = [1, 1]} : vector<16x64xf32> to vector<16x4xf32>
      %32 = vector.extract_strided_slice %14 {offsets = [0, 20], sizes = [16, 4], strides = [1, 1]} : vector<16x64xf32> to vector<16x4xf32>
      %33 = arith.mulf %31, %12 : vector<16x4xf32>
      %34 = arith.mulf %32, %13 : vector<16x4xf32>
      %35 = arith.subf %33, %34 : vector<16x4xf32>
      %36 = arith.mulf %31, %13 : vector<16x4xf32>
      %37 = arith.mulf %32, %12 : vector<16x4xf32>
      %38 = arith.addf %36, %37 : vector<16x4xf32>
      %39 = vector.extract_strided_slice %14 {offsets = [0, 24], sizes = [16, 4], strides = [1, 1]} : vector<16x64xf32> to vector<16x4xf32>
      %40 = vector.extract_strided_slice %14 {offsets = [0, 28], sizes = [16, 4], strides = [1, 1]} : vector<16x64xf32> to vector<16x4xf32>
      %41 = arith.mulf %39, %12 : vector<16x4xf32>
      %42 = arith.mulf %40, %13 : vector<16x4xf32>
      %43 = arith.subf %41, %42 : vector<16x4xf32>
      %44 = arith.mulf %39, %13 : vector<16x4xf32>
      %45 = arith.mulf %40, %12 : vector<16x4xf32>
      %46 = arith.addf %44, %45 : vector<16x4xf32>
      %47 = tpu.concatenate %19, %22, %27, %30, %35, %38, %43, %46 in 1 : vector<16x4xf32>, vector<16x4xf32>, vector<16x4xf32>, vector<16x4xf32>, vector<16x4xf32>, vector<16x4xf32>, vector<16x4xf32>, vector<16x4xf32> -> vector<16x32xf32>
      %48 = arith.truncf %47 : vector<16x32xf32> to vector<16x32xbf16>
      %c0_15 = arith.constant 0 : index
      %c0_16 = arith.constant 0 : index
      %49 = vector.load %arg5[%c0_15, %c0_16] : memref<16x32xbf16, #tpu.memory_space<vmem>>, vector<16x32xbf16>
      tpu.vector_store %arg5[%c0_15, %c0_16], %48 {strides = array<i32>} : memref<16x32xbf16, #tpu.memory_space<vmem>>, vector<16x32xbf16>,
      %50 = vector.extract_strided_slice %14 {offsets = [0, 32], sizes = [16, 4], strides = [1, 1]} : vector<16x64xf32> to vector<16x4xf32>
      %51 = vector.extract_strided_slice %14 {offsets = [0, 36], sizes = [16, 4], strides = [1, 1]} : vector<16x64xf32> to vector<16x4xf32>
      %52 = arith.mulf %50, %12 : vector<16x4xf32>
      %53 = arith.mulf %51, %13 : vector<16x4xf32>
      %54 = arith.subf %52, %53 : vector<16x4xf32>
      %55 = arith.mulf %50, %13 : vector<16x4xf32>
      %56 = arith.mulf %51, %12 : vector<16x4xf32>
      %57 = arith.addf %55, %56 : vector<16x4xf32>
      %58 = vector.extract_strided_slice %14 {offsets = [0, 40], sizes = [16, 4], strides = [1, 1]} : vector<16x64xf32> to vector<16x4xf32>
      %59 = vector.extract_strided_slice %14 {offsets = [0, 44], sizes = [16, 4], strides = [1, 1]} : vector<16x64xf32> to vector<16x4xf32>
      %60 = arith.mulf %58, %12 : vector<16x4xf32>
      %61 = arith.mulf %59, %13 : vector<16x4xf32>
      %62 = arith.subf %60, %61 : vector<16x4xf32>
      %63 = arith.mulf %58, %13 : vector<16x4xf32>
      %64 = arith.mulf %59, %12 : vector<16x4xf32>
      %65 = arith.addf %63, %64 : vector<16x4xf32>
      %66 = tpu.concatenate %54, %57, %62, %65 in 1 : vector<16x4xf32>, vector<16x4xf32>, vector<16x4xf32>, vector<16x4xf32> -> vector<16x16xf32>
      %67 = arith.truncf %66 : vector<16x16xf32> to vector<16x16xbf16>
      %c0_17 = arith.constant 0 : index
      %c0_18 = arith.constant 0 : index
      %68 = vector.load %arg6[%c0_17, %c0_18] : memref<16x16xbf16, #tpu.memory_space<vmem>>, vector<16x16xbf16>
      tpu.vector_store %arg6[%c0_17, %c0_18], %67 {strides = array<i32>} : memref<16x16xbf16, #tpu.memory_space<vmem>>, vector<16x16xbf16>,
      %69 = vector.extract_strided_slice %14 {offsets = [0, 48], sizes = [16, 16], strides = [1, 1]} : vector<16x64xf32> to vector<16x16xf32>
      %70 = arith.truncf %69 : vector<16x16xf32> to vector<16x16xbf16>
      %c0_19 = arith.constant 0 : index
      %c0_20 = arith.constant 0 : index
      %71 = vector.load %arg7[%c0_19, %c0_20] : memref<16x16xbf16, #tpu.memory_space<vmem>>, vector<16x16xbf16>
      tpu.vector_store %arg7[%c0_19, %c0_20], %70 {strides = array<i32>} : memref<16x16xbf16, #tpu.memory_space<vmem>>, vector<16x16xbf16>,
    } else {
    }
    return
  }
  func.func @transform_0(%arg0: i32, %arg1: i32) -> (i32, i32) {
    %c0_i32 = arith.constant 0 : i32
    return %arg0, %arg1 : i32, i32
  }
  func.func @transform_1(%arg0: i32, %arg1: i32) -> (i32, i32) {
    %c0_i32 = arith.constant 0 : i32
    %c0_i32_0 = arith.constant 0 : i32
    return %arg1, %c0_i32 : i32, i32
  }
  func.func @transform_2(%arg0: i32, %arg1: i32) -> (i32, i32) {
    %c0_i32 = arith.constant 0 : i32
    %c0_i32_0 = arith.constant 0 : i32
    return %arg0, %c0_i32 : i32, i32
  }
  func.func @transform_3(%arg0: i32, %arg1: i32) -> (i32, i32) {
    %c0_i32 = arith.constant 0 : i32
    %c0_i32_0 = arith.constant 0 : i32
    return %arg0, %c0_i32 : i32, i32
  }
  func.func @transform_4(%arg0: i32, %arg1: i32) -> (i32, i32) {
    %c0_i32 = arith.constant 0 : i32
    %c0_i32_0 = arith.constant 0 : i32
    return %arg0, %c0_i32 : i32, i32
  }
  func.func @transform_5(%arg0: i32, %arg1: i32) -> (i32, i32) {
    %c0_i32 = arith.constant 0 : i32
    %c0_i32_0 = arith.constant 0 : i32
    return %arg0, %c0_i32 : i32, i32
  }
}

</mosaic_0001>

<bundles_post_ra>
// kernel: tpu_custom_call.1
= control target key start
LH: loop header
LB: loop body
LE: loop exit
PB: predicated region body
PF: predicated region fallthrough
CT: control target
= control target key end

     0   :  { %11 = vsyncpa [#allocation4], 0  ;;  %v658_v1 = vmov 0.0   ;;  %vm659_vm0 = vmmov 0   ;;  %s953_s0 = inlined_call_operand.vmem [shape: bf16[16,32], index: 0, kind: input, shape index: {}]   ;;  %s954_s1 = inlined_call_operand.vmem [shape: bf16[32,64], index: 1, kind: input, shape index: {}]   ;;  %s955_s2 = inlined_call_operand.vmem [shape: f32[16,8], index: 2, kind: input, shape index: {}]   ;;  %s956_s3 = inlined_call_operand.hbm [shape: bf16[16,32], index: 3, kind: output, shape index: {0}]   ;;  %s957_s4 = inlined_call_operand.hbm [shape: bf16[16,16], index: 4, kind: output, shape index: {1}]   ;;  %s958_s5 = inlined_call_operand.hbm [shape: bf16[16,16], index: 5, kind: output, shape index: {2}]  }
   0x1   :  { %v591_v0 = vld [vmem:[%s954_s1 + $0x8] sm:$0xff]   ;;  %522 = vmatprep.subr.bf16.mxu0 %v658_v1  ;;  %v592_v2 = vld [vmem:[%s954_s1] sm:$0xff]   ;;  %526 = vmatprep.mubr.msk.bf16.mxu0 %vm659_vm0, %v658_v1 }
   0x2   :  { %523 = vmatpush3.bf16.msra.mxu0 %v591_v0  ;;  %v718_v3 = vld [vmem:[%s955_s2] sm:$0xff] }
   0x3   :  { %524 = vmatprep.subr.bf16.mxu0 %v658_v1 }
   0x4   :  { %12 = vsyncpa [#allocation6], 0  ;;  %s660_s24 = smov 4   ;;  %s661_s25 = smov 12   ;;  %v593_v4 = vld [vmem:[%s953_s0] sm:$0xff]   ;;  %v729_v5 = vld [vmem:[%s955_s2 + $0x8] sm:$0xff] }
   0x5   :  { %131 = vrot.lane.b32.xlu0 %v718_v3, %s660_s24  ;;  %167 = vrot.lane.b32.xlu1 %v718_v3, %s661_s25  ;;  %vm52_vm1 = vcmask 261120   ;;  %s662_s29 = smov 32   ;;  %s663_s30 = smov 36   ;;  %vm24_vm2 = vcmask 523264   ;;  %vm289_vm3 = vcmask 31744   ;;  %vm292_vm4 = vcmask 64512  }
   0x6   :  { %525 = vmatpush3.bf16.msra.mxu0 %v592_v2  ;;  %s664_s0 = smov 20   ;;  %25 = vst.msk [vmem:[#allocation2] sm:$0xff] %vm24_vm2, %v658_v1  ;;  %26 = vst.msk [vmem:[#allocation2 + $0x8] sm:$0xff] %vm24_vm2, %v658_v1  ;;  %s665_s2 = smov 40   ;;  %vm295_vm5 = vcmask 97280   ;;  %vm298_vm6 = vcmask 130048  }
   0x7   :  { %s666_s6 = smov 44   ;;  %s667_s7 = smov 28   ;;  %vm301_vm7 = vcmask 162816   ;;  %vm304_vm8 = vcmask 195584   ;;  %vm307_vm9 = vcmask 228352   ;;  %vm439_vm10 = vcmask 125952  }
   0x8   :  { %s668_s8 = smov 124   ;;  %s669_s9 = smov 8  }
   0x9   :  { %133 = vrot.lane.b32.xlu0 %v729_v5, %s660_s24  ;;  %169 = vrot.lane.b32.xlu1 %v729_v5, %s661_s25  ;;  %s670_s10 = smov 16   ;;  %s671_s11 = smov 24  }
   0xa   :  { %527 = vmatmul.mubr.msk.bf16.vlgmr.msra.gmra.mxu0 %vm52_vm1, %v593_v4  ;;  %s672_s12 = smov 96   ;;  %s673_s13 = smov 100  }
   0xb   :  { %s674_s14 = smov 80   ;;  %s675_s15 = smov [#allocation5]  }
   0xc   :  { %s473_s16 = sshll.u32 %s675_s15, 4  ;;  %s676_s17 = smov [#allocation7]   ;;  %s474_s16 = int_to_ptr.vmem [resolvable:$true] %s473_s16 }
   0xd   :  { %321 = vrot.lane.b32.xlu0 %v718_v3, %s662_s29  ;;  %323 = vrot.lane.b32.xlu1 %v729_v5, %s662_s29  ;;  %v27_v14 = vld [vmem:[#allocation2] sm:$0xff]  ;;  %v28_v20 = vld [vmem:[#allocation2 + $0x8] sm:$0xff]  ;;  %s485_s18 = sshll.u32 %s676_s17, 4  ;;  %s677_s19 = smov [#allocation3]   ;;  %s931_s18 = int_to_ptr.vmem [resolvable:$true] %s485_s18 }
   0xe   :  { %s461_s20 = sshll.u32 %s677_s19, 4  ;;  %s594_s21 = scalar_lea.vmem %s474_s16, 128  ;;  %s462_s20 = int_to_ptr.vmem [resolvable:$true] %s461_s20 }
   0xf   :  { %p595_p0 = scmp.ne.s32.totalorder %s474_s16, %s594_s21  ;;  %p599_p1 = scmp.lt.s32.totalorder %s474_s16, %s474_s16 }
  0x10   :  { %p600_p2 = scmp.lt.s32.totalorder %s594_s21, %s594_s21 }
  0x11   :  { %339 = vrot.lane.b32.xlu0 %v718_v3, %s663_s30  ;;  %341 = vrot.lane.b32.xlu1 %v729_v5, %s663_s30 }
  0x12   :  { %p601_p3 = por %p600_p2, %p599_p1 }
  0x14   :  { %p602_p4 = pnand %p601_p3, %p595_p0 }
  0x15   :  { %203 = vrot.lane.b32.xlu0 %v718_v3, %s664_s0  ;;  %205 = vrot.lane.b32.xlu1 %v729_v5, %s664_s0 }
  0x19   :  { %357 = vrot.lane.b32.xlu0 %v718_v3, %s665_s2  ;;  %359 = vrot.lane.b32.xlu1 %v729_v5, %s665_s2 }
  0x1d   :  { %375 = vrot.lane.b32.xlu0 %v718_v3, %s666_s6  ;;  %377 = vrot.lane.b32.xlu1 %v729_v5, %s666_s6 }
  0x21   :  { %239 = vrot.lane.b32.xlu0 %v718_v3, %s667_s7  ;;  %241 = vrot.lane.b32.xlu1 %v729_v5, %s667_s7 }
  0x25   :  { %123 = vrot.lane.b32.xlu0 %v718_v3, %s668_s8  ;;  %125 = vrot.lane.b32.xlu1 %v729_v5, %s668_s8 }
  0x29   :  { %149 = vrot.lane.b32.xlu0 %v718_v3, %s669_s9  ;;  %151 = vrot.lane.b32.xlu1 %v729_v5, %s669_s9 }
  0x2d   :  { %185 = vrot.lane.b32.xlu0 %v718_v3, %s670_s10  ;;  %187 = vrot.lane.b32.xlu1 %v729_v5, %s670_s10 }
  0x31   :  { %221 = vrot.lane.b32.xlu0 %v718_v3, %s671_s11  ;;  %223 = vrot.lane.b32.xlu1 %v729_v5, %s671_s11 }
  0x77   :  { %v132_v6 = vpop.permute.xlu0 %131  ;;  %v168_v11 = vpop.permute.xlu1 %167 }
  0x7b   :  { %v134_v7 = vpop.permute.xlu0 %133  ;;  %v170_v13 = vpop.permute.xlu1 %169 }
  0x7f   :  { %v322_v8 = vpop.permute.xlu0 %321  ;;  %v324_v18 = vpop.permute.xlu1 %323 }
  0x83   :  { %v340_v9 = vpop.permute.xlu0 %339  ;;  %v342_v25 = vpop.permute.xlu1 %341 }
  0x87   :  { %v204_v10 = vpop.permute.xlu0 %203  ;;  %v206_v29 = vpop.permute.xlu1 %205 }
  0x8b   :  { %v358_v12 = vpop.permute.xlu0 %357  ;;  %v360_v36 = vpop.permute.xlu1 %359 }
  0x8f   :  { %v376_v16 = vpop.permute.xlu0 %375  ;;  %v378_v39 = vpop.permute.xlu1 %377 }
  0x93   :  { %v240_v24 = vpop.permute.xlu0 %239  ;;  %v242_v44 = vpop.permute.xlu1 %241 }
  0x97   :  { %v124_v28 = vpop.permute.xlu0 %123  ;;  %v126_v48 = vpop.permute.xlu1 %125 }
  0x9b   :  { %v150_v47 = vpop.permute.xlu0 %149  ;;  %v152_v54 = vpop.permute.xlu1 %151 }
  0x9f   :  { %v186_v51 = vpop.permute.xlu0 %185  ;;  %v188_v58 = vpop.permute.xlu1 %187 }
  0xa3   :  { %v222_v57 = vpop.permute.xlu0 %221  ;;  %v224_v63 = vpop.permute.xlu1 %223 }
  0xca   :  { %v90_v15 = vpop.f32.mrf.mxu0 }
  0xcb   :  { %v97_v17 = vadd.f32 %v90_v15, %v27_v14 }
  0xcc   :  { %v528_v19 = vpop.f32.mrf.mxu0 }
  0xcd   :  { %100 = vst.msk [vmem:[#allocation2] sm:$0xff] %vm24_vm2, %v97_v17 }
  0xce   :  { %v93_v21 = vpop.f32.mrf.mxu0 }
  0xcf   :  { %v98_v22 = vadd.f32 %v93_v21, %v28_v20 }
  0xd0   :  { %v529_v23 = vpop.f32.mrf.mxu0 }
  0xd1   :  { %101 = vst.msk [vmem:[#allocation2 + $0x8] sm:$0xff] %vm24_vm2, %v98_v22 }
  0xd4   :  { %v760_v26 = vld [vmem:[#allocation2] sm:$0xff] }
  0xd5   :  { %v763_v27 = vmul.f32 %v132_v6, %v760_v26  ;;  %v129_v31 = vmul.f32 %v124_v28, %v760_v26  ;;  %v774_v33 = vmul.f32 %v168_v11, %v760_v26  ;;  %v784_v35 = vmul.f32 %v322_v8, %v760_v26 }
  0xd6   :  { %v794_v38 = vmul.f32 %v340_v9, %v760_v26  ;;  %v804_v41 = vmul.f32 %v204_v10, %v760_v26  ;;  %v814_v43 = vmul.f32 %v358_v12, %v760_v26  ;;  %v381_v46 = vmul.f32 %v376_v16, %v760_v26 }
  0xd7   :  { %141 = vrot.lane.b32.xlu0 %v763_v27, %s668_s8  ;;  %v245_v50 = vmul.f32 %v240_v24, %v760_v26  ;;  %v834_v53 = vmul.f32 %v760_v26, %v718_v3  ;;  %v840_v55 = vmul.f32 %v150_v47, %v760_v26  ;;  %v843_v56 = vmul.f32 %v186_v51, %v760_v26 }
  0xd8   :  { %v767_v30 = vld [vmem:[#allocation2 + $0x8] sm:$0xff]  ;;  %v850_v59 = vmul.f32 %v222_v57, %v760_v26 }
  0xd9   :  { %v771_v32 = vmul.f32 %v134_v7, %v767_v30  ;;  %v781_v34 = vmul.f32 %v170_v13, %v767_v30  ;;  %v791_v37 = vmul.f32 %v324_v18, %v767_v30  ;;  %v801_v40 = vmul.f32 %v342_v25, %v767_v30 }
  0xda   :  { %v811_v42 = vmul.f32 %v206_v29, %v767_v30  ;;  %v821_v45 = vmul.f32 %v360_v36, %v767_v30  ;;  %v382_v49 = vmul.f32 %v378_v39, %v767_v30  ;;  %v246_v52 = vmul.f32 %v242_v44, %v767_v30 }
  0xdb   :  { %143 = vrot.lane.b32.xlu1 %v771_v32, %s668_s8  ;;  %177 = vrot.lane.b32.xlu0 %v774_v33, %s668_s8  ;;  %v854_v60 = vmul.f32 %v767_v30, %v729_v5  ;;  %v861_v61 = vmul.f32 %v152_v54, %v767_v30  ;;  %v864_v62 = vmul.f32 %v188_v58, %v767_v30 }
  0xdc   :  { %v871_v0 = vmul.f32 %v224_v63, %v767_v30  ;;  %v130_v2 = vmul.f32 %v126_v48, %v767_v30 }
  0xdf   :  { %179 = vrot.lane.b32.xlu1 %v781_v34, %s668_s8  ;;  %331 = vrot.lane.b32.xlu0 %v784_v35, %s668_s8 }
  0xe3   :  { %333 = vrot.lane.b32.xlu1 %v791_v37, %s668_s8  ;;  %349 = vrot.lane.b32.xlu0 %v794_v38, %s668_s8 }
  0xe7   :  { %351 = vrot.lane.b32.xlu1 %v801_v40, %s668_s8  ;;  %213 = vrot.lane.b32.xlu0 %v804_v41, %s668_s8 }
  0xeb   :  { %215 = vrot.lane.b32.xlu1 %v811_v42, %s668_s8  ;;  %367 = vrot.lane.b32.xlu0 %v814_v43, %s668_s8 }
  0xef   :  { %369 = vrot.lane.b32.xlu1 %v821_v45, %s668_s8  ;;  %385 = vrot.lane.b32.xlu0 %v381_v46, %s668_s8 }
  0xf3   :  { %387 = vrot.lane.b32.xlu1 %v382_v49, %s668_s8  ;;  %249 = vrot.lane.b32.xlu0 %v245_v50, %s668_s8 }
  0xf7   :  { %251 = vrot.lane.b32.xlu1 %v246_v52, %s668_s8  ;;  %113 = vrot.lane.b32.xlu0 %v834_v53, %s668_s8 }
  0xfb   :  { %195 = vrot.lane.b32.xlu1 %v843_v56, %s668_s8  ;;  %159 = vrot.lane.b32.xlu0 %v840_v55, %s668_s8 }
  0xff   :  { %115 = vrot.lane.b32.xlu1 %v854_v60, %s668_s8  ;;  %231 = vrot.lane.b32.xlu0 %v850_v59, %s668_s8 }
 0x103   :  { %161 = vrot.lane.b32.xlu1 %v861_v61, %s668_s8  ;;  %197 = vrot.lane.b32.xlu0 %v864_v62, %s668_s8 }
 0x107   :  { %233 = vrot.lane.b32.xlu1 %v871_v0, %s668_s8 }
 0x149   :  { %v142_v1 = vpop.permute.xlu0 %141 }
 0x14a   :  { %v147_v5 = vadd.f32 %v142_v1, %v129_v31 }
 0x14d   :  { %v144_v3 = vpop.permute.xlu1 %143  ;;  %v178_v4 = vpop.permute.xlu0 %177 }
 0x14e   :  { %v148_v6 = vadd.f32 %v144_v3, %v130_v2  ;;  %v183_v10 = vadd.f32 %v178_v4, %v763_v27 }
 0x150   :  { %v551_v7 = vpack.i.bf16 %v148_v6, %v147_v5 }
 0x151   :  { %v180_v8 = vpop.permute.xlu1 %179  ;;  %v332_v9 = vpop.permute.xlu0 %331 }
 0x152   :  { %v184_v11 = vadd.f32 %v180_v8, %v771_v32  ;;  %552 = vrot.lane.b32.xlu0 %v551_v7, %s660_s24  ;;  %v337_v15 = vsub.f32 %v784_v35, %v332_v9 }
 0x154   :  { %v556_v12 = vpack.i.bf16 %v184_v11, %v183_v10 }
 0x155   :  { %v334_v13 = vpop.permute.xlu1 %333  ;;  %v350_v14 = vpop.permute.xlu0 %349 }
 0x156   :  { %v338_v16 = vsub.f32 %v791_v37, %v334_v13  ;;  %557 = vrot.lane.b32.xlu1 %v556_v12, %s660_s24  ;;  %v355_v20 = vadd.f32 %v350_v14, %v245_v50 }
 0x158   :  { %v561_v17 = vpack.i.bf16 %v338_v16, %v337_v15 }
 0x159   :  { %v352_v18 = vpop.permute.xlu1 %351  ;;  %v214_v19 = vpop.permute.xlu0 %213 }
 0x15a   :  { %v356_v21 = vadd.f32 %v352_v18, %v246_v52  ;;  %562 = vrot.lane.b32.xlu0 %v561_v17, %s672_s12  ;;  %v219_v25 = vadd.f32 %v214_v19, %v774_v33 }
 0x15c   :  { %v566_v22 = vpack.i.bf16 %v356_v21, %v355_v20 }
 0x15d   :  { %v216_v23 = vpop.permute.xlu1 %215  ;;  %v368_v24 = vpop.permute.xlu0 %367 }
 0x15e   :  { %v220_v27 = vadd.f32 %v216_v23, %v781_v34  ;;  %567 = vrot.lane.b32.xlu1 %v566_v22, %s673_s13  ;;  %v373_v32 = vsub.f32 %v814_v43, %v368_v24 }
 0x160   :  { %v571_v28 = vpack.i.bf16 %v220_v27, %v219_v25 }
 0x161   :  { %v370_v29 = vpop.permute.xlu1 %369  ;;  %v386_v31 = vpop.permute.xlu0 %385 }
 0x162   :  { %v374_v35 = vsub.f32 %v821_v45, %v370_v29  ;;  %572 = vrot.lane.b32.xlu0 %v571_v28, %s660_s24  ;;  %v391_v39 = vadd.f32 %v386_v31, %v794_v38  ;;  %v517_v45 = vpack.c.bf16 %v760_v26, %v760_v26  ;;  %v518_v38 = vpack.c.bf16 %v767_v30, %v767_v30 }
 0x164   :  { %v576_v36 = vpack.i.bf16 %v374_v35, %v373_v32 }
 0x165   :  { %v388_v37 = vpop.permute.xlu1 %387  ;;  %v250_v33 = vpop.permute.xlu0 %249 }
 0x166   :  { %v392_v44 = vadd.f32 %v388_v37, %v801_v40  ;;  %577 = vrot.lane.b32.xlu1 %v576_v36, %s672_s12  ;;  %v255_v47 = vadd.f32 %v250_v33, %v804_v41 }
 0x168   :  { %v581_v34 = vpack.i.bf16 %v392_v44, %v391_v39 }
 0x169   :  { %v252_v46 = vpop.permute.xlu1 %251  ;;  %v114_v40 = vpop.permute.xlu0 %113 }
 0x16a   :  { %v256_v48 = vadd.f32 %v252_v46, %v811_v42  ;;  %582 = vrot.lane.b32.xlu0 %v581_v34, %s673_s13  ;;  %v119_v1 = vsub.f32 %v834_v53, %v114_v40 }
 0x16c   :  { %v586_v43 = vpack.i.bf16 %v256_v48, %v255_v47 }
 0x16d   :  { %v196_v49 = vpop.permute.xlu1 %195  ;;  %v160_v50 = vpop.permute.xlu0 %159 }
 0x16e   :  { %587 = vrot.lane.b32.xlu1 %v586_v43, %s660_s24  ;;  %448 = vrot.lane.b32.xlu0 %v517_v45, %s674_s14  ;;  %v165_v8 = vsub.f32 %v840_v55, %v160_v50  ;;  %v201_v20 = vsub.f32 %v843_v56, %v196_v49 }
 0x171   :  { %v116_v51 = vpop.permute.xlu1 %115  ;;  %v896_v41 = vpop.permute.xlu0 %231 }
 0x172   :  { %450 = vrot.lane.b32.xlu1 %v518_v38, %s674_s14  ;;  %v120_v30 = vsub.f32 %v854_v60, %v116_v51  ;;  %v237_v37 = vsub.f32 %v850_v59, %v896_v41 }
 0x175   :  { %v162_v42 = vpop.permute.xlu1 %161  ;;  %v198_v52 = vpop.permute.xlu0 %197 }
 0x176   :  { %v166_v9 = vsub.f32 %v861_v61, %v162_v42  ;;  %v202_v21 = vsub.f32 %v864_v62, %v198_v52 }
 0x179   :  { %v898_v54 = vpop.permute.xlu1 %233 }
 0x17a   :  { %v238_v39 = vsub.f32 %v871_v0, %v898_v54 }
 0x1c4   :  { %v553_v57 = vpop.permute.xlu0 %552 }
 0x1c5   :  { %v555_v58 = vunpack.i.h.bf16 %v553_v57  ;;  %v554_v63 = vunpack.i.l.bf16 %v553_v57 }
 0x1c7   :  { %v291_v4 = vsel %vm289_vm3, %v120_v30, %v555_v58  ;;  %v290_v5 = vsel %vm289_vm3, %v119_v1, %v554_v63 }
 0x1c8   :  { %v558_v26 = vpop.permute.xlu1 %557  ;;  %v293_v60 = vsel %vm292_vm4, %v290_v5, %v165_v8  ;;  %v294_v11 = vsel %vm292_vm4, %v291_v4, %v166_v9 }
 0x1c9   :  { %v560_v6 = vunpack.i.h.bf16 %v558_v26  ;;  %v559_v7 = vunpack.i.l.bf16 %v558_v26 }
 0x1cb   :  { %v296_v14 = vsel %vm295_vm5, %v293_v60, %v559_v7  ;;  %v297_v15 = vsel %vm295_vm5, %v294_v11, %v560_v6 }
 0x1cc   :  { %v563_v2 = vpop.permute.xlu0 %562  ;;  %v299_v28 = vsel %vm298_vm6, %v296_v14, %v201_v20  ;;  %v300_v29 = vsel %vm298_vm6, %v297_v15, %v202_v21 }
 0x1cd   :  { %v565_v17 = vunpack.i.h.bf16 %v563_v2  ;;  %v564_v61 = vunpack.i.l.bf16 %v563_v2 }
 0x1d0   :  { %v568_v3 = vpop.permute.xlu1 %567 }
 0x1d1   :  { %v570_v12 = vunpack.i.h.bf16 %v568_v3  ;;  %v569_v13 = vunpack.i.l.bf16 %v568_v3 }
 0x1d3   :  { %v425_v23 = vsel %vm289_vm3, %v564_v61, %v569_v13  ;;  %v426_v24 = vsel %vm289_vm3, %v565_v17, %v570_v12 }
 0x1d4   :  { %v573_v10 = vpop.permute.xlu0 %572 }
 0x1d5   :  { %v575_v18 = vunpack.i.h.bf16 %v573_v10  ;;  %v574_v19 = vunpack.i.l.bf16 %v573_v10 }
 0x1d7   :  { %v302_v62 = vsel %vm301_vm7, %v299_v28, %v574_v19  ;;  %v303_v32 = vsel %vm301_vm7, %v300_v29, %v575_v18 }
 0x1d8   :  { %v578_v53 = vpop.permute.xlu1 %577  ;;  %v305_v43 = vsel %vm304_vm8, %v302_v62, %v237_v37  ;;  %v306_v45 = vsel %vm304_vm8, %v303_v32, %v238_v39 }
 0x1d9   :  { %v580_v16 = vunpack.i.h.bf16 %v578_v53  ;;  %v579_v55 = vunpack.i.l.bf16 %v578_v53 }
 0x1db   :  { %v427_v31 = vsel %vm292_vm4, %v425_v23, %v579_v55  ;;  %v428_v56 = vsel %vm292_vm4, %v426_v24, %v580_v16 }
 0x1dc   :  { %v583_v22 = vpop.permute.xlu0 %582 }
 0x1dd   :  { %v585_v25 = vunpack.i.h.bf16 %v583_v22  ;;  %v584_v27 = vunpack.i.l.bf16 %v583_v22 }
 0x1df   :  { %v429_v35 = vsel %vm295_vm5, %v427_v31, %v584_v27  ;;  %v430_v36 = vsel %vm295_vm5, %v428_v56, %v585_v25 }
 0x1e0   :  { %v515_v44 = vpack.c.bf16 %v429_v35, %v429_v35  ;;  %v516_v33 = vpack.c.bf16 %v430_v36, %v430_v36  ;;  %v588_v34 = vpop.permute.xlu1 %587  ;;  %v449_v46 = vpop.permute.xlu0 %448 }
 0x1e1   :  { %v590_v47 = vunpack.i.h.bf16 %v588_v34  ;;  %v589_v48 = vunpack.i.l.bf16 %v588_v34  ;;  %454 = vst.msk [vmem:[#allocation7] sm:$0xf] %vm439_vm10, %v449_v46 }
 0x1e2   :  { %440 = vst.msk [vmem:[#allocation5] sm:$0xf] %vm439_vm10, %v515_v44  ;;  %441 = vst.msk [vmem:[#allocation5 + $0x4] sm:$0xf] %vm439_vm10, %v516_v33 }
 0x1e3   :  { %v308_v59 = vsel %vm307_vm9, %v305_v43, %v589_v48  ;;  %v309_v0 = vsel %vm307_vm9, %v306_v45, %v590_v47 }
 0x1e4   :  { %605 = shalt.err (!%p602_p4)
}
 0x1e5   :  { %s678_s22 = smov 64   ;;  %vm318_vm11 = vcmask 257024   ;;  %v513_v38 = vpack.c.bf16 %v308_v59, %v308_v59  ;;  %v514_v40 = vpack.c.bf16 %v309_v0, %v309_v0  ;;  %v451_v49 = vpop.permute.xlu1 %450  ;;  %s614_s26 = scalar_lea.vmem %s931_s18, 128 }
 0x1e6   :  { %479 = dma.vmem_to_hbm [thread:$0]  %s474_s16, 128, %s957_s4, [#allocation6], %s678_s22, %s678_s22, %s660_s24   ;;  %455 = vst.msk [vmem:[#allocation7 + $0x4] sm:$0xf] %vm439_vm10, %v451_v49 }
 0x1e7   :  { %319 = vst.msk [vmem:[#allocation3] sm:$0xf] %vm318_vm11, %v513_v38  ;;  %320 = vst.msk [vmem:[#allocation3 + $0x4] sm:$0xf] %vm318_vm11, %v514_v40  ;;  %p615_p5 = scmp.ne.s32.totalorder %s931_s18, %s614_s26  ;;  %p619_p6 = scmp.lt.s32.totalorder %s931_s18, %s931_s18 }
 0x1e8   :  { %p620_p7 = scmp.lt.s32.totalorder %s614_s26, %s614_s26 }
 0x1ea   :  { %p621_p8 = por %p620_p7, %p619_p6 }
 0x1ec   :  { %p622_p9 = pnand %p621_p8, %p615_p5 }
 0x1ee   :  { %625 = shalt.err (!%p622_p9)
}
 0x1ef   :  { %491 = dma.vmem_to_hbm [thread:$0]  %s931_s18, 128, %s958_s5, [#allocation6], %s678_s22, %s678_s22, %s660_s24  }
 0x1f0   :  { %s634_s1 = scalar_lea.vmem %s462_s20, 128  ;;  %p639_p11 = scmp.lt.s32.totalorder %s462_s20, %s462_s20 }
 0x1f1   :  { %p635_p10 = scmp.ne.s32.totalorder %s462_s20, %s634_s1  ;;  %p640_p12 = scmp.lt.s32.totalorder %s634_s1, %s634_s1 }
 0x1f3   :  { %p641_p13 = por %p640_p12, %p639_p11 }
 0x1f5   :  { %p642_p0 = pnand %p641_p13, %p635_p10 }
 0x1f7   :  { %645 = shalt.err (!%p642_p0)
}
 0x1f8   :  { %467 = dma.vmem_to_hbm [thread:$0]  %s462_s20, 128, %s956_s3, [#allocation4], %s678_s22, %s678_s22, %s660_s24  }
 0x1f9   :  { %654 = dma.done.wait [#allocation4], 128  }
 0x1fa   :  { %655 = vsyncadd [#allocation4], 4294967168 }
 0x1fb   :  { %656 = dma.done.wait [#allocation6], 256  }
 0x1fc   :  { %657 = vsyncadd [#allocation6], 4294967040 }
 0x1fd   :  { %501 = vsyncpa [#allocation4], 1 }
 0x1fe   :  { %502 = vsyncpa [#allocation6], 1 }

</bundles_post_ra>
